<compile_context>
chip_gen: v7x
topology: tpu7x:2x2x1
jax: 0.10.0
libtpu: 0.0.40
codegen_flags: <defaults>
</compile_context>

<pallas_src>
import functools

import jax
import jax.numpy as jnp
from jax import lax
from jax.experimental import pallas as pl
from jax.experimental.pallas import tpu as pltpu

F_PAD = 128  # lane-dense padded feature width (covers input=8, hidden=32, out=4)


def _round_up(v, m):
    return ((v + m - 1) // m) * m


def _vmem_usable_bytes():
    """Generation-aware usable VMEM: physical capacity minus ~1/8 reserve."""
    try:
        cap = int(pltpu.get_tpu_info().vmem_capacity_bytes)
    except Exception:
        cap = 64 << 20  # conservative default (v7x per-TC)
    reserve = max(8 << 20, cap // 8)  # 8 MiB on 64 MiB parts, 16 MiB on 128 MiB
    return cap - reserve


# ----------------------------- Pallas kernel -------------------------------

def _gcn4_fused_kernel(a_ref, x_ref, w_ref, b_ref, o_ref, xw_ref,
                       *, tm, num_layers, out_dim):
    """grid = (layer, row_tile); both axes sequential ("arbitrary").

    a_ref : (n_pad, n_pad)  bf16  A_hat, VMEM-resident for the whole grid
    x_ref : (n_pad, F_PAD)  bf16  padded node features, resident
    w_ref : (L, F_PAD, F_PAD) bf16 weight stack, resident
    b_ref : (L, 1, F_PAD)   f32   bias stack, resident
    o_ref : (tm, F_PAD)     f32   output row tile (written only at last layer)
    xw_ref: (2, n_pad, F_PAD) bf16 XW ping-pong staging (slot = layer parity)
    """
    l = pl.program_id(0)          # layer index (outer, strictly sequential)
    i = pl.program_id(1)          # node-row tile index (inner)
    cur = l % 2                   # XW slot read this layer
    nxt = 1 - cur                 # XW slot written for the next layer

    # One-time init for the whole kernel: XW_0 = X @ W_0.
    @pl.when((l == 0) & (i == 0))
    def _():
        xw0 = jnp.dot(x_ref[...], w_ref[0], preferred_element_type=jnp.float32)
        xw_ref[0] = xw0.astype(xw_ref.dtype)

    # Aggregate this row tile: y = A_hat[rows, :] @ XW_l + b_l   (f32 acc).
    row0 = pl.multiple_of(i * tm, tm)
    a_tile = a_ref[pl.ds(row0, tm), :]                       # (tm, n_pad) bf16
    y = jnp.dot(a_tile, xw_ref[cur],
                preferred_element_type=jnp.float32)          # (tm, F_PAD) f32
    y = y + b_ref[l]                                         # (1, F_PAD) bias

    @pl.when(l < num_layers - 1)
    def _():
        # ReLU; F.dropout(training=False) == identity between layers.
        h = jnp.maximum(y, 0.0).astype(jnp.bfloat16)
        # Fused next-layer feature GEMM for this row tile (no per-layer
        # full-graph i==0 stall; overlaps with the A_hat @ XW MXU work).
        xw_next = jnp.dot(h, w_ref[l + 1],
                          preferred_element_type=jnp.float32)
        xw_ref[nxt, pl.ds(row0, tm), :] = xw_next.astype(xw_ref.dtype)
        # Note: o_ref intentionally NOT written here; the last layer (which is
        # the last visitor of every output block) writes the real result.

    @pl.when(l == num_layers - 1)
    def _():
        # Fused log_softmax over the real output lanes (padded lanes masked).
        lane = lax.broadcasted_iota(jnp.int32, y.shape, 1)
        ym = jnp.where(lane < out_dim, y, -1e30)
        m = jnp.max(ym, axis=1, keepdims=True)
        s = ym - m
        lse = jnp.log(jnp.sum(jnp.exp(s), axis=1, keepdims=True))
        o_ref[...] = (s - lse).astype(o_ref.dtype)


# ----------------------------- glue (plain JAX) ----------------------------

def build_normalized_adj(edge_index, num_nodes):
    """A_hat = D^-1/2 (A + I) D^-1/2; duplicate edges are summed (PyG-style)."""
    src = edge_index[0]
    dst = edge_index[1]
    adj = jnp.zeros((num_nodes, num_nodes), dtype=jnp.float32)
    adj = adj.at[dst, src].add(1.0)                       # aggregate at target
    adj = adj + jnp.eye(num_nodes, dtype=jnp.float32)     # self-loops
    deg = jnp.sum(adj, axis=1)
    d_inv_sqrt = jax.lax.rsqrt(jnp.maximum(deg, 1e-12))
    return adj * d_inv_sqrt[:, None] * d_inv_sqrt[None, :]


def init_params(key, input_dim, hidden_dim, output_dim):
    dims = [(input_dim, hidden_dim),
            (hidden_dim, hidden_dim),
            (hidden_dim, hidden_dim),
            (hidden_dim, output_dim)]
    params = []
    for i, (fi, fo) in enumerate(dims):
        kw, _ = jax.random.split(jax.random.fold_in(key, i))
        scale = jnp.sqrt(6.0 / (fi + fo))
        w = jax.random.uniform(kw, (fi, fo), jnp.float32, -scale, scale)
        b = jnp.zeros((fo,), jnp.float32)
        params.append((w, b))
    return params


def gcn4_forward(x, edge_index, params):
    n, in_dim = x.shape
    out_dim = int(params[-1][0].shape[1])
    num_layers = len(params)

    # Row tiling: n_pad is a multiple of 128 (lane-dense A_hat tiles); tm is as
    # large as possible (whole graph when <= 1024 rows, else 512) to amortize
    # the ~0.35us/grid-step overhead on fast MXUs.
    n128 = _round_up(max(n, 1), 128)
    if n128 <= 1024:
        tm = n128
        n_pad = n128
    else:
        tm = 512
        n_pad = _round_up(n, tm)
    n_tiles = n_pad // tm

    # --- preprocessing (plain JAX): dense normalized adjacency + zero padding ---
    a_hat = build_normalized_adj(edge_index, n)
    a_pad = jnp.zeros((n_pad, n_pad), jnp.float32).at[:n, :n].set(a_hat)
    a_pad = a_pad.astype(jnp.bfloat16)                     # bf16 MXU feed
    x_pad = jnp.zeros((n_pad, F_PAD), jnp.float32).at[:n, :in_dim].set(x)
    x_pad = x_pad.astype(jnp.bfloat16)                     # pre-cast to bf16

    w_list, b_list = [], []
    for (w, b) in params:
        fi, fo = w.shape
        w_list.append(jnp.zeros((F_PAD, F_PAD), jnp.float32).at[:fi, :fo].set(w))
        b_list.append(jnp.zeros((F_PAD,), jnp.float32).at[:fo].set(b))
    w_stack = jnp.stack(w_list).astype(jnp.bfloat16)           # (L, 128, 128)
    b_stack = jnp.stack(b_list).reshape(num_layers, 1, F_PAD)  # (L, 1, 128) f32

    # --- VMEM footprint (resident inputs single-buffered) ---
    est = (n_pad * n_pad * 2                      # A_hat (bf16), resident
           + n_pad * F_PAD * 2                    # X (bf16), resident
           + num_layers * F_PAD * F_PAD * 2       # weight stack (bf16), resident
           + num_layers * F_PAD * 4               # bias stack (f32), resident
           + 2 * tm * F_PAD * 4                   # output block (f32, 2-buffered)
           + 2 * n_pad * F_PAD * 2)               # XW ping-pong scratch (bf16)
    headroom = 2 << 20
    usable = _vmem_usable_bytes()
    assert est + headroom <= usable, (
        "graph too large for the fully VMEM-resident fused kernel; "
        "TODO(synk): add an A_hat column-tiled reduction path for very large N")
    vmem_limit = min(max(est + headroom, 16 << 20), usable)

    kernel = functools.partial(_gcn4_fused_kernel, tm=tm,
                               num_layers=num_layers, out_dim=out_dim)

    resident = pl.Buffered(1)  # constant-index inputs: no double buffering

    out_pad = pl.pallas_call(
        kernel,
        out_shape=jax.ShapeDtypeStruct((n_pad, F_PAD), jnp.float32),
        grid_spec=pltpu.PrefetchScalarGridSpec(
            num_scalar_prefetch=0,
            grid=(num_layers, n_tiles),
            in_specs=[
                # A_hat: constant block index, single-buffered, VMEM-resident.
                pl.BlockSpec((n_pad, n_pad), lambda l, i: (0, 0),
                             pipeline_mode=resident),
                pl.BlockSpec((n_pad, F_PAD), lambda l, i: (0, 0),
                             pipeline_mode=resident),
                pl.BlockSpec((num_layers, F_PAD, F_PAD), lambda l, i: (0, 0, 0),
                             pipeline_mode=resident),
                pl.BlockSpec((num_layers, 1, F_PAD), lambda l, i: (0, 0, 0),
                             pipeline_mode=resident),
            ],
            out_specs=pl.BlockSpec((tm, F_PAD), lambda l, i: (i, 0)),
            scratch_shapes=[
                pltpu.VMEM((2, n_pad, F_PAD), jnp.bfloat16),   # XW ping-pong
            ],
        ),
        compiler_params=pltpu.CompilerParams(
            # Both axes "arbitrary": scratch carries cross-layer/cross-tile state.
            dimension_semantics=("arbitrary", "arbitrary"),
            vmem_limit_bytes=vmem_limit,
        ),
    )(a_pad, x_pad, w_stack, b_stack)

    return out_pad[:n, :out_dim]


# ----------------------------- main ----------------------------------------

if __name__ == "__main__":
    key = jax.random.PRNGKey(0)
    N = 16
    INPUT_DIM = 8
    HIDDEN_DIM = 32
    OUTPUT_DIM = 4

    kx, kp = jax.random.split(key)
    x = jax.random.normal(kx, (N, INPUT_DIM), jnp.float32)

    # Deterministic ring graph with both directions: [2, E] src->dst edges.
    src = jnp.arange(N, dtype=jnp.int32)
    dst = (src + 1) % N
    edge_index = jnp.stack(
        [jnp.concatenate([src, dst]), jnp.concatenate([dst, src])], axis=0)

    params = init_params(kp, INPUT_DIM, HIDDEN_DIM, OUTPUT_DIM)

    fwd = jax.jit(gcn4_forward)
    out = jax.block_until_ready(fwd(x, edge_index, params))

    assert out.shape == (N, OUTPUT_DIM)
    assert bool(jnp.all(jnp.isfinite(out)))
    # log_softmax rows must sum (in prob space) to ~1.
    assert jnp.allclose(jnp.sum(jnp.exp(out), axis=1), 1.0, atol=1e-3)

    # Pure-JAX f32 reference of the same forward pass (bf16 MXU => loose tol).
    a_ref = build_normalized_adj(edge_index, N)
    h = x
    for li, (w, b) in enumerate(params):
        h = a_ref @ (h @ w) + b
        if li < len(params) - 1:
            h = jnp.maximum(h, 0.0)
    ref = jax.nn.log_softmax(h, axis=1)
    assert jnp.allclose(out, ref, atol=2e-1), float(jnp.max(jnp.abs(out - ref)))

    print("KERNEL_OK")
</pallas_src>

<mosaic_0001>
module attributes {stable_mosaic.version = 11 : i64} {
  func.func private @main(%arg0: i32) attributes {dimension_semantics = [#tpu.dimension_semantics<core_parallel>], iteration_bounds = array<i64: 2>, tpu.core_type = #tpu.core_type<sc_scalar_subcore>, window_params = []} {
    return
  }
}

module attributes {stable_mosaic.version = 11 : i64} {
  func.func private @main(%arg0: i32) attributes {dimension_semantics = [#tpu.dimension_semantics<core_parallel>], iteration_bounds = array<i64: 2>, tpu.core_type = #tpu.core_type<sc_scalar_subcore>, window_params = []} {
    return
  }
}

module attributes {stable_mosaic.version = 11 : i64} {
  func.func @_gcn4_fused_kernel(%arg0: i32, %arg1: i32, %arg2: memref<128x128xbf16, #tpu.memory_space<vmem>>, %arg3: memref<128x128xbf16, #tpu.memory_space<vmem>>, %arg4: memref<4x128x128xbf16, #tpu.memory_space<vmem>>, %arg5: memref<4x1x128xf32, #tpu.memory_space<vmem>>, %arg6: memref<128x128xf32, #tpu.memory_space<vmem>>, %arg7: memref<2x128x128xbf16, #tpu.memory_space<vmem>>) attributes {dimension_semantics = [#tpu.dimension_semantics<arbitrary>, #tpu.dimension_semantics<arbitrary>], iteration_bounds = array<i64: 4, 1>, scalar_prefetch = 0 : i64, scratch_operands = 1 : i64, tpu.core_type = #tpu.core_type<tc>, window_params = [{pipeline_mode = #tpu.pipeline_mode<synchronous>, transform_indices = @transform_0, window_bounds = array<i64: 128, 128>}, {pipeline_mode = #tpu.pipeline_mode<synchronous>, transform_indices = @transform_1, window_bounds = array<i64: 128, 128>}, {pipeline_mode = #tpu.pipeline_mode<synchronous>, transform_indices = @transform_2, window_bounds = array<i64: 4, 128, 128>}, {pipeline_mode = #tpu.pipeline_mode<synchronous>, transform_indices = @transform_3, window_bounds = array<i64: 4, 1, 128>}, {transform_indices = @transform_4, window_bounds = array<i64: 128, 128>}]} {
    %c2_i32 = arith.constant 2 : i32
    %c0_i32 = arith.constant 0 : i32
    %0 = arith.cmpi eq, %c2_i32, %c0_i32 : i32
    %c1_i32 = arith.constant 1 : i32
    %1 = arith.select %0, %c1_i32, %c2_i32 : i32
    %2 = arith.remsi %arg0, %1 : i32
    %c0_i32_0 = arith.constant 0 : i32
    %3 = arith.cmpi ne, %2, %c0_i32_0 : i32
    %c0_i32_1 = arith.constant 0 : i32
    %4 = arith.cmpi slt, %2, %c0_i32_1 : i32
    %c0_i32_2 = arith.constant 0 : i32
    %5 = arith.cmpi slt, %1, %c0_i32_2 : i32
    %6 = arith.xori %4, %5 : i1
    %7 = arith.andi %6, %3 : i1
    %8 = arith.addi %2, %1 : i32
    %9 = arith.select %7, %8, %2 : i32
    %c1_i32_3 = arith.constant 1 : i32
    %10 = arith.subi %c1_i32_3, %9 : i32
    %c0_i32_4 = arith.constant 0 : i32
    %11 = arith.cmpi eq, %arg0, %c0_i32_4 : i32
    %c0_i32_5 = arith.constant 0 : i32
    %12 = arith.cmpi eq, %arg1, %c0_i32_5 : i32
    %13 = arith.andi %11, %12 : i1
    %14 = arith.extui %13 : i1 to i32
    %c0_i32_6 = arith.constant 0 : i32
    %15 = arith.cmpi ne, %14, %c0_i32_6 : i32
    scf.if %15 {
      %c0_14 = arith.constant 0 : index
      %c0_15 = arith.constant 0 : index
      %35 = vector.load %arg3[%c0_14, %c0_15] : memref<128x128xbf16, #tpu.memory_space<vmem>>, vector<128x128xbf16>
      %c0_16 = arith.constant 0 : index
      %c0_17 = arith.constant 0 : index
      %c0_18 = arith.constant 0 : index
      %36 = vector.load %arg4[%c0_16, %c0_17, %c0_18] : memref<4x128x128xbf16, #tpu.memory_space<vmem>>, vector<1x128x128xbf16>
      %37 = vector.shape_cast %36 : vector<1x128x128xbf16> to vector<128x128xbf16>
      %cst_19 = arith.constant dense<0.000000e+00> : vector<128x128xf32>
      %38 = tpu.matmul %35, %37, %cst_19 {dimension_numbers = #tpu.dot_dimension_numbers<[1], [0], [0], [1], [0, 0, 1, 1], [], []>} : vector<128x128xbf16>, vector<128x128xbf16>, vector<128x128xf32> -> vector<128x128xf32>
      %39 = arith.truncf %38 : vector<128x128xf32> to vector<128x128xbf16>
      %c0_20 = arith.constant 0 : index
      %c0_21 = arith.constant 0 : index
      %c0_22 = arith.constant 0 : index
      %40 = vector.load %arg7[%c0_20, %c0_21, %c0_22] : memref<2x128x128xbf16, #tpu.memory_space<vmem>>, vector<1x128x128xbf16>
      %41 = vector.shape_cast %40 : vector<1x128x128xbf16> to vector<128x128xbf16>
      %42 = vector.shape_cast %39 : vector<128x128xbf16> to vector<1x128x128xbf16>
      tpu.vector_store %arg7[%c0_20, %c0_21, %c0_22], %42 {strides = array<i32>} : memref<2x128x128xbf16, #tpu.memory_space<vmem>>, vector<1x128x128xbf16>,
    } else {
    }
    %c128_i32 = arith.constant 128 : i32
    %16 = arith.muli %arg1, %c128_i32 : i32
    %17 = tpu.assume_multiple %16, 128 : i32
    %18 = arith.index_cast %17 : i32 to index
    %c0 = arith.constant 0 : index
    %19 = vector.load %arg2[%18, %c0] : memref<128x128xbf16, #tpu.memory_space<vmem>>, vector<128x128xbf16>
    %20 = arith.index_cast %9 : i32 to index
    %c0_7 = arith.constant 0 : index
    %c0_8 = arith.constant 0 : index
    %21 = vector.load %arg7[%20, %c0_7, %c0_8] : memref<2x128x128xbf16, #tpu.memory_space<vmem>>, vector<1x128x128xbf16>
    %22 = vector.shape_cast %21 : vector<1x128x128xbf16> to vector<128x128xbf16>
    %cst = arith.constant dense<0.000000e+00> : vector<128x128xf32>
    %23 = tpu.matmul %19, %22, %cst {dimension_numbers = #tpu.dot_dimension_numbers<[1], [0], [0], [1], [0, 0, 1, 1], [], []>} : vector<128x128xbf16>, vector<128x128xbf16>, vector<128x128xf32> -> vector<128x128xf32>
    %24 = arith.index_cast %arg0 : i32 to index
    %c0_9 = arith.constant 0 : index
    %c0_10 = arith.constant 0 : index
    %25 = vector.load %arg5[%24, %c0_9, %c0_10] : memref<4x1x128xf32, #tpu.memory_space<vmem>>, vector<1x1x128xf32>
    %26 = vector.shape_cast %25 : vector<1x1x128xf32> to vector<1x128xf32>
    %27 = vector.broadcast %26 : vector<1x128xf32> to vector<128x128xf32>
    %28 = arith.addf %23, %27 : vector<128x128xf32>
    %c3_i32 = arith.constant 3 : i32
    %29 = arith.cmpi slt, %arg0, %c3_i32 : i32
    %30 = arith.extui %29 : i1 to i32
    %c0_i32_11 = arith.constant 0 : i32
    %31 = arith.cmpi ne, %30, %c0_i32_11 : i32
    scf.if %31 {
      %cst_14 = arith.constant 0.000000e+00 : f32
      %35 = vector.broadcast %cst_14 : f32 to vector<128x128xf32>
      %36 = arith.maximumf %28, %35 : vector<128x128xf32>
      %37 = arith.truncf %36 : vector<128x128xf32> to vector<128x128xbf16>
      %c1_i32_15 = arith.constant 1 : i32
      %38 = arith.addi %arg0, %c1_i32_15 : i32
      %39 = arith.index_cast %38 : i32 to index
      %c0_16 = arith.constant 0 : index
      %c0_17 = arith.constant 0 : index
      %40 = vector.load %arg4[%39, %c0_16, %c0_17] : memref<4x128x128xbf16, #tpu.memory_space<vmem>>, vector<1x128x128xbf16>
      %41 = vector.shape_cast %40 : vector<1x128x128xbf16> to vector<128x128xbf16>
      %cst_18 = arith.constant dense<0.000000e+00> : vector<128x128xf32>
      %42 = tpu.matmul %37, %41, %cst_18 {dimension_numbers = #tpu.dot_dimension_numbers<[1], [0], [0], [1], [0, 0, 1, 1], [], []>} : vector<128x128xbf16>, vector<128x128xbf16>, vector<128x128xf32> -> vector<128x128xf32>
      %43 = arith.truncf %42 : vector<128x128xf32> to vector<128x128xbf16>
      %44 = arith.index_cast %10 : i32 to index
      %45 = arith.index_cast %17 : i32 to index
      %c0_19 = arith.constant 0 : index
      %46 = vector.load %arg7[%44, %45, %c0_19] : memref<2x128x128xbf16, #tpu.memory_space<vmem>>, vector<1x128x128xbf16>
      %47 = vector.shape_cast %46 : vector<1x128x128xbf16> to vector<128x128xbf16>
      %48 = vector.shape_cast %43 : vector<128x128xbf16> to vector<1x128x128xbf16>
      tpu.vector_store %arg7[%44, %45, %c0_19], %48 {strides = array<i32>} : memref<2x128x128xbf16, #tpu.memory_space<vmem>>, vector<1x128x128xbf16>,
    } else {
    }
    %c3_i32_12 = arith.constant 3 : i32
    %32 = arith.cmpi eq, %arg0, %c3_i32_12 : i32
    %33 = arith.extui %32 : i1 to i32
    %c0_i32_13 = arith.constant 0 : i32
    %34 = arith.cmpi ne, %33, %c0_i32_13 : i32
    scf.if %34 {
      %35 = tpu.iota {dimensions = array<i32: 1>} : vector<128x128xi32>
      %c4_i32 = arith.constant 4 : i32
      %36 = vector.broadcast %c4_i32 : i32 to vector<128x128xi32>
      %37 = arith.cmpi slt, %35, %36 : vector<128x128xi32>
      %cst_14 = arith.constant -1.000000e+30 : f32
      %38 = vector.broadcast %cst_14 : f32 to vector<128x128xf32>
      %39 = arith.select %37, %28, %38 : vector<128x128xi1>, vector<128x128xf32>
      %cst_15 = arith.constant dense<0xFF800000> : vector<128xf32>
      %40 = vector.multi_reduction <maximumf>, %39, %cst_15 [1] : vector<128x128xf32> to vector<128xf32>
      %41 = vector.shape_cast %40 : vector<128xf32> to vector<128x1xf32>
      %42 = vector.broadcast %41 : vector<128x1xf32> to vector<128x128xf32>
      %43 = arith.subf %39, %42 : vector<128x128xf32>
      %44 = math.exp %43 : vector<128x128xf32>
      %cst_16 = arith.constant dense<0.000000e+00> : vector<128xf32>
      %45 = vector.multi_reduction <add>, %44, %cst_16 [1] : vector<128x128xf32> to vector<128xf32>
      %46 = vector.shape_cast %45 : vector<128xf32> to vector<128x1xf32>
      %47 = math.log %46 : vector<128x1xf32>
      %48 = vector.broadcast %47 : vector<128x1xf32> to vector<128x128xf32>
      %49 = arith.subf %43, %48 : vector<128x128xf32>
      %c0_17 = arith.constant 0 : index
      %c0_18 = arith.constant 0 : index
      %50 = vector.load %arg6[%c0_17, %c0_18] : memref<128x128xf32, #tpu.memory_space<vmem>>, vector<128x128xf32>
      tpu.vector_store %arg6[%c0_17, %c0_18], %49 {strides = array<i32>} : memref<128x128xf32, #tpu.memory_space<vmem>>, vector<128x128xf32>,
    } else {
    }
    return
  }
  func.func @transform_0(%arg0: i32, %arg1: i32) -> (i32, i32) {
    %c0_i32 = arith.constant 0 : i32
    %c0_i32_0 = arith.constant 0 : i32
    %c0_i32_1 = arith.constant 0 : i32
    return %c0_i32, %c0_i32_0 : i32, i32
  }
  func.func @transform_1(%arg0: i32, %arg1: i32) -> (i32, i32) {
    %c0_i32 = arith.constant 0 : i32
    %c0_i32_0 = arith.constant 0 : i32
    %c0_i32_1 = arith.constant 0 : i32
    return %c0_i32, %c0_i32_0 : i32, i32
  }
  func.func @transform_2(%arg0: i32, %arg1: i32) -> (i32, i32, i32) {
    %c0_i32 = arith.constant 0 : i32
    %c0_i32_0 = arith.constant 0 : i32
    %c0_i32_1 = arith.constant 0 : i32
    %c0_i32_2 = arith.constant 0 : i32
    return %c0_i32, %c0_i32_0, %c0_i32_1 : i32, i32, i32
  }
  func.func @transform_3(%arg0: i32, %arg1: i32) -> (i32, i32, i32) {
    %c0_i32 = arith.constant 0 : i32
    %c0_i32_0 = arith.constant 0 : i32
    %c0_i32_1 = arith.constant 0 : i32
    %c0_i32_2 = arith.constant 0 : i32
    return %c0_i32, %c0_i32_0, %c0_i32_1 : i32, i32, i32
  }
  func.func @transform_4(%arg0: i32, %arg1: i32) -> (i32, i32) {
    %c0_i32 = arith.constant 0 : i32
    %c0_i32_0 = arith.constant 0 : i32
    return %arg1, %c0_i32 : i32, i32
  }
}

</mosaic_0001>

<bundles_post_ra>
// kernel: gcn4_forward.1
= control target key start
LH: loop header
LB: loop body
LE: loop exit
PB: predicated region body
PF: predicated region fallthrough
CT: control target
= control target key end

     0   :  { %s1544_s15 = smov 0   ;;  %s1546_s16 = smov 0   ;;  %s1893_s0 = inlined_call_operand.vmem [shape: bf16[128,128], index: 0, kind: input, shape index: {}]   ;;  %s1894_s1 = inlined_call_operand.vmem [shape: bf16[128,128], index: 1, kind: input, shape index: {}]   ;;  %s1895_s2 = inlined_call_operand.vmem [shape: bf16[4,128,128], index: 2, kind: input, shape index: {}]   ;;  %s1896_s3 = inlined_call_operand.vmem [shape: f32[4,1,128], index: 3, kind: input, shape index: {}]   ;;  %s1897_s4 = inlined_call_operand.vmem [shape: f32[128,128], index: 4, kind: output, shape index: {}]  }
   0x1   :  { %s1548_s17 = smov 0  }
   0x2 LB: > { %s26_s18 = sadd.s32 1, %s1513_s16  ;;  %p1115_p0 = scmp.ge.s32.totalorder %s1517_s17, 1  ;;  %s1517_s17 = sphi %s1548_s17, %s14_s17   ;;  %s1513_s16 = sphi %s1546_s16, %s1899_s16   ;;  %s1509_s15 = sphi %s1544_s15, %s1898_s15  }
   0x3   : > { %p28_p1 = scmp.ge.s32.totalorder %s26_s18, 4  ;;  %p164_p2 = scmp.lt.s32.totalorder %s1517_s17, 5 }
   0x5   : > { %s1901_s18 = smov (%p28_p1, %s26_s18), 0  ;;  %p165_p3 = pnand %p1115_p0, %p164_p2 }
   0x6   : > { %p192_p4 = scmp.lt.s32.totalorder (!%p165_p3), %s1509_s15, 0  ;;  %s193_s19 = ssub.s32 (!%p165_p3), 0, %s1509_s15 }
   0x7   : > { %168 = sbr.rel (%p165_p3) target bundleno = 1115 (0x45b), region = 36  ;;  %s1116_s20 = smin.u32 (!%p165_p3), %s1509_s15, %s193_s19 }
   0x8   : > { %p205_p5 = scmp.eq.s32.totalorder (!%p165_p3), %s1509_s15, 0  ;;  %s195_s21 = sand.u32 (!%p165_p3), 1, %s1116_s20  }
   0x9   : > { %s196_s22 = ssub.s32 (!%p165_p3), 0, %s195_s21 }
   0xe   : > { %s1903_s22 = smov (!%p192_p4, %s196_s22), %s195_s21  ;;  %210 = sbr.rel (!%p205_p5) target bundleno = 274 (0x112), region = 40 }
   0xf   : > { %p1118_p6 = scmp.lt.s32.totalorder %s1903_s22, 0  ;;  %s202_s23 = sadd.s32 2, %s1903_s22  ;;  %v1399_v0 = vld [vmem:[%s1895_s2] sm:$0xff] (%p205_p5)   ;;  %v1400_v1 = vld [vmem:[%s1895_s2 + $0x8] sm:$0xff] (%p205_p5)   ;;  %v1401_v2 = vld [vmem:[%s1895_s2 + $0x10] sm:$0xff] (%p205_p5)  }
  0x10   : > { %1231 = vmatprep.subr.bf16.mxu0 (%p205_p5), %v1399_v0  ;;  %1327 = vmatprep.subr.bf16.mxu1 (%p205_p5), %v1399_v0  ;;  %v1402_v3 = vld [vmem:[%s1895_s2 + $0x18] sm:$0xff] (%p205_p5)   ;;  %v1407_v4 = vld [vmem:[%s1894_s1] sm:$0xff] (%p205_p5)   ;;  %v1404_v7 = vld [vmem:[%s1895_s2 + $0x28] sm:$0xff] (%p205_p5)  }
  0x11   : > { %s1905_s23 = smov (!%p1118_p6, %s202_s23), %s1903_s22  ;;  %1232 = vmatpush3.bf16.msra.mxu0 (%p205_p5), %v1399_v0  ;;  %1335 = vmatpush3.bf16.msra.mxu1 (%p205_p5), %v1399_v0  ;;  %v1408_v5 = vld [vmem:[%s1894_s1 + $0x20] sm:$0xff] (%p205_p5)   ;;  %v1405_v8 = vld [vmem:[%s1895_s2 + $0x30] sm:$0xff] (%p205_p5)   ;;  %v1406_v9 = vld [vmem:[%s1895_s2 + $0x38] sm:$0xff] (%p205_p5)  }
  0x12   : > { %s204_s24 = ssub.s32 1, %s1905_s23  ;;  %1233 = vmatprep.subr.bf16.mxu0 (%p205_p5), %v1400_v1  ;;  %1328 = vmatprep.subr.bf16.mxu1 (%p205_p5), %v1400_v1  ;;  %v1403_v6 = vld [vmem:[%s1895_s2 + $0x20] sm:$0xff] (%p205_p5)   ;;  %v1409_v10 = vld [vmem:[%s1894_s1 + $0x8] sm:$0xff] (%p205_p5)   ;;  %v1411_v12 = vld [vmem:[%s1894_s1 + $0x10] sm:$0xff] (%p205_p5)  }
  0x13   : > { %1247 = vmatprep.mubr.bf16.mxu0 (%p205_p5), %v1407_v4  ;;  %1255 = vmatprep.mubr.bf16.mxu1 (%p205_p5), %v1408_v5  ;;  %v1410_v11 = vld [vmem:[%s1894_s1 + $0x28] sm:$0xff] (%p205_p5)   ;;  %v1412_v13 = vld [vmem:[%s1894_s1 + $0x30] sm:$0xff] (%p205_p5)   ;;  %v1413_v14 = vld [vmem:[%s1894_s1 + $0x18] sm:$0xff] (%p205_p5)  }
  0x14   : > { %v1414_v15 = vld [vmem:[%s1894_s1 + $0x38] sm:$0xff] (%p205_p5)  }
  0x15   : > { %1234 = vmatpush3.bf16.msra.mxu0 %v1400_v1  ;;  %1336 = vmatpush3.bf16.msra.mxu1 %v1400_v1 }
  0x16   : > { %1235 = vmatprep.subr.bf16.mxu0 %v1401_v2  ;;  %1329 = vmatprep.subr.bf16.mxu1 %v1401_v2 }
  0x19   : > { %1236 = vmatpush3.bf16.msra.mxu0 %v1401_v2  ;;  %1337 = vmatpush3.bf16.msra.mxu1 %v1401_v2 }
  0x1a   : > { %1237 = vmatprep.subr.bf16.mxu0 %v1402_v3  ;;  %1330 = vmatprep.subr.bf16.mxu1 %v1402_v3 }
  0x1d   : > { %1238 = vmatpush3.bf16.msra.mxu0 %v1402_v3  ;;  %1338 = vmatpush3.bf16.msra.mxu1 %v1402_v3 }
  0x1e   : > { %1239 = vmatprep.subr.bf16.mxu0 %v1403_v6  ;;  %1331 = vmatprep.subr.bf16.mxu1 %v1403_v6 }
  0x21   : > { %1240 = vmatpush3.bf16.msra.mxu0 %v1403_v6  ;;  %1339 = vmatpush3.bf16.msra.mxu1 %v1403_v6 }
  0x22   : > { %1241 = vmatprep.subr.bf16.mxu0 %v1404_v7  ;;  %1332 = vmatprep.subr.bf16.mxu1 %v1404_v7 }
  0x25   : > { %1242 = vmatpush3.bf16.msra.mxu0 %v1404_v7  ;;  %1340 = vmatpush3.bf16.msra.mxu1 %v1404_v7 }
  0x26   : > { %1243 = vmatprep.subr.bf16.mxu0 %v1405_v8  ;;  %1333 = vmatprep.subr.bf16.mxu1 %v1405_v8 }
  0x29   : > { %1244 = vmatpush3.bf16.msra.mxu0 %v1405_v8  ;;  %1341 = vmatpush3.bf16.msra.mxu1 %v1405_v8 }
  0x2a   : > { %1245 = vmatprep.subr.bf16.mxu0 %v1406_v9  ;;  %1334 = vmatprep.subr.bf16.mxu1 %v1406_v9 }
  0x2d   : > { %1246 = vmatpush3.bf16.msra.mxu0 %v1406_v9  ;;  %1342 = vmatpush3.bf16.msra.mxu1 %v1406_v9 }
  0x30   : > { %1248 = vmatmul.mubr.bf16.vlgmr.msra.gmra.mrb[0].mxu0 %v1409_v10  ;;  %1256 = vmatmul.mubr.bf16.vlgmr.msra.gmra.mrb[0].mxu1 %v1410_v11 }
  0x31   : > { %1251 = vmatprep.mubr.bf16.mxu0 %v1411_v12  ;;  %1259 = vmatprep.mubr.bf16.mxu1 %v1412_v13 }
  0x38   : > { %1252 = vmatmul.mubr.bf16.gmra.mrb[4].mxu0 %v1413_v14  ;;  %1260 = vmatmul.mubr.bf16.gmra.mrb[4].mxu1 %v1414_v15 }
 0x103   : > { %v1249_v16 = vpop.f32.mrb[0].mxu0  ;;  %v1257_v17 = vpop.f32.mrb[0].mxu1 }
 0x104   : > { %v373_v18 = vpop.f32.mrb[1].mxu0  ;;  %v405_v19 = vpop.f32.mrb[1].mxu1 }
 0x105   : > { %v1250_v20 = vpop.f32.mrb[2].mxu0  ;;  %v1258_v21 = vpop.f32.mrb[2].mxu1 }
 0x106   : > { %v437_v22 = vpack.c.bf16 %v1250_v20, %v1249_v16  ;;  %v441_v23 = vpack.c.bf16 %v1258_v21, %v1257_v17  ;;  %v376_v24 = vpop.f32.mrb[3].mxu0  ;;  %v408_v25 = vpop.f32.mrb[3].mxu1 }
 0x107   : > { %v436_v26 = vpack.c.bf16 %v376_v24, %v373_v18  ;;  %v440_v27 = vpack.c.bf16 %v408_v25, %v405_v19 }
 0x108   : > { %445 = vst [vmem:[#allocation2 + $0x8] sm:$0xff] %v437_v22  ;;  %449 = vst [vmem:[#allocation2 + $0x28] sm:$0xff] %v441_v23 }
 0x109   : > { %444 = vst [vmem:[#allocation2] sm:$0xff] %v436_v26  ;;  %448 = vst [vmem:[#allocation2 + $0x20] sm:$0xff] %v440_v27 }
 0x10b   : > { %v1253_v28 = vpop.f32.mrb[4].mxu0  ;;  %v1261_v29 = vpop.f32.mrb[4].mxu1 }
 0x10c   : > { %v389_v30 = vpop.f32.mrb[5].mxu0  ;;  %v421_v31 = vpop.f32.mrb[5].mxu1 }
 0x10d   : > { %v1254_v32 = vpop.f32.mrb[6].mxu0  ;;  %v1262_v33 = vpop.f32.mrb[6].mxu1 }
 0x10e   : > { %v439_v34 = vpack.c.bf16 %v1254_v32, %v1253_v28  ;;  %v443_v35 = vpack.c.bf16 %v1262_v33, %v1261_v29  ;;  %v392_v36 = vpop.f32.mrb[7].mxu0  ;;  %v424_v37 = vpop.f32.mrb[7].mxu1 }
 0x10f   : > { %v438_v38 = vpack.c.bf16 %v392_v36, %v389_v30  ;;  %v442_v39 = vpack.c.bf16 %v424_v37, %v421_v31 }
 0x110   : > { %447 = vst [vmem:[#allocation2 + $0x18] sm:$0xff] %v439_v34  ;;  %451 = vst [vmem:[#allocation2 + $0x38] sm:$0xff] %v443_v35 }
 0x111   : > { %446 = vst [vmem:[#allocation2 + $0x10] sm:$0xff] %v438_v38  ;;  %450 = vst [vmem:[#allocation2 + $0x30] sm:$0xff] %v442_v39 }
 0x112 PF: > { %s1181_s11 = sshll.u32 %s1905_s23, 6  ;;  %v1415_v40 = vld [vmem:[%s1893_s0] sm:$0xff]   ;;  %v1417_v50 = vld [vmem:[%s1893_s0 + $0x8] sm:$0xff]   ;;  %v1419_v52 = vld [vmem:[%s1893_s0 + $0x10] sm:$0xff]   ;;  %p1147_p7 = scmp.ge.s32.totalorder %s1509_s15, 3 }
 0x113   : > { %s1623_s14 = scalar_lea.vmem [#allocation2], %s1181_s11  ;;  %1279 = vmatprep.mubr.bf16.mxu0 %v1415_v40  ;;  %v1416_v43 = vld [vmem:[%s1893_s0 + $0x20] sm:$0xff]   ;;  %v1418_v51 = vld [vmem:[%s1893_s0 + $0x28] sm:$0xff]   ;;  %v1420_v53 = vld [vmem:[%s1893_s0 + $0x30] sm:$0xff]   ;;  %s484_s11 = scalar_lea.vmem %s1896_s3, %s1509_s15 }
 0x114   : > { %1287 = vmatprep.mubr.bf16.mxu1 %v1416_v43  ;;  %v1421_v54 = vld [vmem:[%s1893_s0 + $0x18] sm:$0xff]   ;;  %v1138_v56 = vld [vmem:[%s484_s11] ss:$0 sm:$0xff]  ;;  %s1148_s12 = sshll.u32 (!%p1147_p7), %s1509_s15, 6  ;;  %s1182_s20 = sshll.u32 (!%p1147_p7), %s204_s24, 6 }
 0x115   : > { %v1422_v55 = vld [vmem:[%s1893_s0 + $0x38] sm:$0xff]   ;;  %s1699_s19 = scalar_lea.vmem (!%p1147_p7), %s1895_s2, %s1148_s12  ;;  %s843_s21 = scalar_lea.vmem (!%p1147_p7), [#allocation2], %s1182_s20 }
 0x116   : > { %v1423_v29 = vld [vmem:[%s1699_s19 + $0x40] sm:$0xff] (!%p1147_p7)   ;;  %v1424_v30 = vld [vmem:[%s1699_s19 + $0x48] sm:$0xff] (!%p1147_p7)   ;;  %v1425_v33 = vld [vmem:[%s1699_s19 + $0x50] sm:$0xff] (!%p1147_p7)  }
 0x117   : > { %v1426_v34 = vld [vmem:[%s1699_s19 + $0x58] sm:$0xff] (!%p1147_p7)   ;;  %v1427_v35 = vld [vmem:[%s1699_s19 + $0x60] sm:$0xff] (!%p1147_p7)   ;;  %v1428_v36 = vld [vmem:[%s1699_s19 + $0x68] sm:$0xff] (!%p1147_p7)  }
 0x118   : > { %v476_v41 = vld [vmem:[%s1623_s14] sm:$0xff]  ;;  %v477_v42 = vld [vmem:[%s1623_s14 + $0x8] sm:$0xff]  ;;  %v478_v44 = vld [vmem:[%s1623_s14 + $0x10] sm:$0xff] }
 0x119   : > { %1263 = vmatprep.subr.bf16.mxu0 %v476_v41  ;;  %1343 = vmatprep.subr.bf16.mxu1 %v476_v41  ;;  %v479_v45 = vld [vmem:[%s1623_s14 + $0x18] sm:$0xff]  ;;  %v480_v46 = vld [vmem:[%s1623_s14 + $0x20] sm:$0xff]  ;;  %v481_v47 = vld [vmem:[%s1623_s14 + $0x28] sm:$0xff] }
 0x11a   : > { %1264 = vmatpush3.bf16.msra.mxu0 %v476_v41  ;;  %1351 = vmatpush3.bf16.msra.mxu1 %v476_v41  ;;  %v482_v48 = vld [vmem:[%s1623_s14 + $0x30] sm:$0xff]  ;;  %v483_v49 = vld [vmem:[%s1623_s14 + $0x38] sm:$0xff] }
 0x11b   : > { %1265 = vmatprep.subr.bf16.mxu0 %v477_v42  ;;  %1344 = vmatprep.subr.bf16.mxu1 %v477_v42  ;;  %v1429_v37 = vld [vmem:[%s1699_s19 + $0x70] sm:$0xff] (!%p1147_p7)   ;;  %v1430_v38 = vld [vmem:[%s1699_s19 + $0x78] sm:$0xff] (!%p1147_p7)  }
 0x11e   : > { %1266 = vmatpush3.bf16.msra.mxu0 %v477_v42  ;;  %1352 = vmatpush3.bf16.msra.mxu1 %v477_v42 }
 0x11f   : > { %1267 = vmatprep.subr.bf16.mxu0 %v478_v44  ;;  %1345 = vmatprep.subr.bf16.mxu1 %v478_v44 }
 0x122   : > { %1268 = vmatpush3.bf16.msra.mxu0 %v478_v44  ;;  %1353 = vmatpush3.bf16.msra.mxu1 %v478_v44 }
 0x123   : > { %1269 = vmatprep.subr.bf16.mxu0 %v479_v45  ;;  %1346 = vmatprep.subr.bf16.mxu1 %v479_v45 }
 0x126   : > { %1270 = vmatpush3.bf16.msra.mxu0 %v479_v45  ;;  %1354 = vmatpush3.bf16.msra.mxu1 %v479_v45 }
 0x127   : > { %1271 = vmatprep.subr.bf16.mxu0 %v480_v46  ;;  %1347 = vmatprep.subr.bf16.mxu1 %v480_v46 }
 0x12a   : > { %1272 = vmatpush3.bf16.msra.mxu0 %v480_v46  ;;  %1355 = vmatpush3.bf16.msra.mxu1 %v480_v46 }
 0x12b   : > { %1273 = vmatprep.subr.bf16.mxu0 %v481_v47  ;;  %1348 = vmatprep.subr.bf16.mxu1 %v481_v47 }
 0x12e   : > { %1274 = vmatpush3.bf16.msra.mxu0 %v481_v47  ;;  %1356 = vmatpush3.bf16.msra.mxu1 %v481_v47 }
 0x12f   : > { %1275 = vmatprep.subr.bf16.mxu0 %v482_v48  ;;  %1349 = vmatprep.subr.bf16.mxu1 %v482_v48 }
 0x132   : > { %1276 = vmatpush3.bf16.msra.mxu0 %v482_v48  ;;  %1357 = vmatpush3.bf16.msra.mxu1 %v482_v48 }
 0x133   : > { %1277 = vmatprep.subr.bf16.mxu0 %v483_v49  ;;  %1350 = vmatprep.subr.bf16.mxu1 %v483_v49 }
 0x136   : > { %1278 = vmatpush3.bf16.msra.mxu0 %v483_v49  ;;  %1358 = vmatpush3.bf16.msra.mxu1 %v483_v49 }
 0x137   : > { %1295 = vmatprep.subr.bf16.mxu0 (!%p1147_p7), %v1423_v29  ;;  %1359 = vmatprep.subr.bf16.mxu1 (!%p1147_p7), %v1423_v29 }
 0x139   : > { %1280 = vmatmul.mubr.bf16.vlgmr.msra.gmra.mrb[0].mxu0 %v1417_v50  ;;  %1288 = vmatmul.mubr.bf16.vlgmr.msra.gmra.mrb[0].mxu1 %v1418_v51 }
 0x13a   : > { %1283 = vmatprep.mubr.bf16.mxu0 %v1419_v52  ;;  %1291 = vmatprep.mubr.bf16.mxu1 %v1420_v53 }
 0x13b   : > { %1296 = vmatpush3.bf16.msra.mxu0 (!%p1147_p7), %v1423_v29  ;;  %1367 = vmatpush3.bf16.msra.mxu1 (!%p1147_p7), %v1423_v29 }
 0x13c   : > { %1297 = vmatprep.subr.bf16.mxu0 (!%p1147_p7), %v1424_v30  ;;  %1360 = vmatprep.subr.bf16.mxu1 (!%p1147_p7), %v1424_v30 }
 0x13f   : > { %1298 = vmatpush3.bf16.msra.mxu0 (!%p1147_p7), %v1424_v30  ;;  %1368 = vmatpush3.bf16.msra.mxu1 (!%p1147_p7), %v1424_v30 }
 0x140   : > { %1299 = vmatprep.subr.bf16.mxu0 (!%p1147_p7), %v1425_v33  ;;  %1361 = vmatprep.subr.bf16.mxu1 (!%p1147_p7), %v1425_v33 }
 0x141   : > { %1284 = vmatmul.mubr.bf16.gmra.mrb[4].mxu0 %v1421_v54  ;;  %1292 = vmatmul.mubr.bf16.gmra.mrb[4].mxu1 %v1422_v55 }
 0x143   : > { %1300 = vmatpush3.bf16.msra.mxu0 (!%p1147_p7), %v1425_v33  ;;  %1369 = vmatpush3.bf16.msra.mxu1 (!%p1147_p7), %v1425_v33 }
 0x144   : > { %1301 = vmatprep.subr.bf16.mxu0 (!%p1147_p7), %v1426_v34  ;;  %1362 = vmatprep.subr.bf16.mxu1 (!%p1147_p7), %v1426_v34 }
 0x147   : > { %1302 = vmatpush3.bf16.msra.mxu0 (!%p1147_p7), %v1426_v34  ;;  %1370 = vmatpush3.bf16.msra.mxu1 (!%p1147_p7), %v1426_v34 }
 0x148   : > { %1303 = vmatprep.subr.bf16.mxu0 (!%p1147_p7), %v1427_v35  ;;  %1363 = vmatprep.subr.bf16.mxu1 (!%p1147_p7), %v1427_v35 }
 0x14b   : > { %1304 = vmatpush3.bf16.msra.mxu0 (!%p1147_p7), %v1427_v35  ;;  %1371 = vmatpush3.bf16.msra.mxu1 (!%p1147_p7), %v1427_v35 }
 0x14c   : > { %1305 = vmatprep.subr.bf16.mxu0 (!%p1147_p7), %v1428_v36  ;;  %1364 = vmatprep.subr.bf16.mxu1 (!%p1147_p7), %v1428_v36 }
 0x14f   : > { %1306 = vmatpush3.bf16.msra.mxu0 (!%p1147_p7), %v1428_v36  ;;  %1372 = vmatpush3.bf16.msra.mxu1 (!%p1147_p7), %v1428_v36 }
 0x150   : > { %1307 = vmatprep.subr.bf16.mxu0 (!%p1147_p7), %v1429_v37  ;;  %1365 = vmatprep.subr.bf16.mxu1 (!%p1147_p7), %v1429_v37 }
 0x153   : > { %1308 = vmatpush3.bf16.msra.mxu0 (!%p1147_p7), %v1429_v37  ;;  %1373 = vmatpush3.bf16.msra.mxu1 (!%p1147_p7), %v1429_v37 }
 0x154   : > { %1309 = vmatprep.subr.bf16.mxu0 (!%p1147_p7), %v1430_v38  ;;  %1366 = vmatprep.subr.bf16.mxu1 (!%p1147_p7), %v1430_v38 }
 0x157   : > { %1310 = vmatpush3.bf16.msra.mxu0 (!%p1147_p7), %v1430_v38  ;;  %1374 = vmatpush3.bf16.msra.mxu1 (!%p1147_p7), %v1430_v38 }
 0x20c   : > { %v1281_v57 = vpop.f32.mrb[0].mxu0  ;;  %v1289_v58 = vpop.f32.mrb[0].mxu1 }
 0x20d   : > { %v1658_v59 = vadd.f32 %v1281_v57, %v1138_v56  ;;  %v1660_v60 = vadd.f32 %v1289_v58, %v1138_v56  ;;  %v574_v61 = vpop.f32.mrb[1].mxu0  ;;  %v606_v62 = vpop.f32.mrb[1].mxu1 }
 0x20e   : > { %v1662_v63 = vadd.f32 %v1138_v56, %v574_v61  ;;  %v1664_v0 = vadd.f32 %v1138_v56, %v606_v62  ;;  %v1282_v1 = vpop.f32.mrb[2].mxu0  ;;  %v1290_v2 = vpop.f32.mrb[2].mxu1 }
 0x20f   : > { %v1666_v3 = vadd.f32 %v1282_v1, %v1138_v56  ;;  %v1668_v4 = vadd.f32 %v1290_v2, %v1138_v56  ;;  %v577_v5 = vpop.f32.mrb[3].mxu0  ;;  %v609_v6 = vpop.f32.mrb[3].mxu1  ;;  %v643_v39 = vmax.f32 (!%p1147_p7), %v1658_v59, 0.0  ;;  %v651_v41 = vmax.f32 (!%p1147_p7), %v1660_v60, 0.0 }
 0x210   : > { %v1670_v7 = vadd.f32 %v1138_v56, %v577_v5  ;;  %v1672_v8 = vadd.f32 %v1138_v56, %v609_v6  ;;  %v641_v25 = vmax.f32 (!%p1147_p7), %v1662_v63, 0.0  ;;  %v649_v27 = vmax.f32 (!%p1147_p7), %v1664_v0, 0.0 }
 0x211   : > { %v644_v40 = vmax.f32 (!%p1147_p7), %v1666_v3, 0.0  ;;  %v652_v42 = vmax.f32 (!%p1147_p7), %v1668_v4, 0.0 }
 0x212   : > { %640 = sbr.rel (%p1147_p7) target bundleno = 761 (0x2f9), region = 44  ;;  %v642_v26 = vmax.f32 (!%p1147_p7), %v1670_v7, 0.0  ;;  %v650_v28 = vmax.f32 (!%p1147_p7), %v1672_v8, 0.0 }
 0x213   : > { %v658_v47 = vpack.c.bf16 (!%p1147_p7), %v644_v40, %v643_v39  ;;  %v662_v48 = vpack.c.bf16 (!%p1147_p7), %v652_v42, %v651_v41 }
 0x214   : > { %v1285_v9 = vpop.f32.mrb[4].mxu0  ;;  %v1293_v10 = vpop.f32.mrb[4].mxu1  ;;  %v657_v31 = vpack.c.bf16 (!%p1147_p7), %v642_v26, %v641_v25  ;;  %v661_v32 = vpack.c.bf16 (!%p1147_p7), %v650_v28, %v649_v27 }
 0x215   : > { %v1674_v11 = vadd.f32 %v1285_v9, %v1138_v56  ;;  %v1676_v12 = vadd.f32 %v1293_v10, %v1138_v56  ;;  %v590_v13 = vpop.f32.mrb[5].mxu0  ;;  %v622_v14 = vpop.f32.mrb[5].mxu1 }
 0x216   : > { %v1678_v15 = vadd.f32 %v1138_v56, %v590_v13  ;;  %v1680_v16 = vadd.f32 %v1138_v56, %v622_v14  ;;  %v1286_v17 = vpop.f32.mrb[6].mxu0  ;;  %v1294_v18 = vpop.f32.mrb[6].mxu1  ;;  %1311 = vmatprep.mubr.bf16.mxu0 (!%p1147_p7), %v657_v31  ;;  %1319 = vmatprep.mubr.bf16.mxu1 (!%p1147_p7), %v661_v32 }
 0x217   : > { %v1682_v19 = vadd.f32 %v1286_v17, %v1138_v56  ;;  %v1684_v20 = vadd.f32 %v1294_v18, %v1138_v56  ;;  %v593_v21 = vpop.f32.mrb[7].mxu0  ;;  %v625_v22 = vpop.f32.mrb[7].mxu1  ;;  %1312 = vmatmul.mubr.bf16.vlgmr.msra.gmra.mrb[0].mxu0 (!%p1147_p7), %v658_v47  ;;  %1320 = vmatmul.mubr.bf16.vlgmr.msra.gmra.mrb[0].mxu1 (!%p1147_p7), %v662_v48  ;;  %v647_v51 = vmax.f32 (!%p1147_p7), %v1674_v11, 0.0  ;;  %v655_v53 = vmax.f32 (!%p1147_p7), %v1676_v12, 0.0 }
 0x218   : > { %v1686_v23 = vadd.f32 %v1138_v56, %v593_v21  ;;  %v1688_v24 = vadd.f32 %v1138_v56, %v625_v22  ;;  %v645_v43 = vmax.f32 (!%p1147_p7), %v1678_v15, 0.0  ;;  %v653_v45 = vmax.f32 (!%p1147_p7), %v1680_v16, 0.0 }
 0x219   : > { %v648_v52 = vmax.f32 %v1682_v19, 0.0  ;;  %v656_v54 = vmax.f32 %v1684_v20, 0.0 }
 0x21a   : > { %v646_v44 = vmax.f32 %v1686_v23, 0.0  ;;  %v654_v46 = vmax.f32 %v1688_v24, 0.0 }
 0x21b   : > { %v660_v55 = vpack.c.bf16 %v648_v52, %v647_v51  ;;  %v664_v56 = vpack.c.bf16 %v656_v54, %v655_v53 }
 0x21c   : > { %v659_v49 = vpack.c.bf16 %v646_v44, %v645_v43  ;;  %v663_v50 = vpack.c.bf16 %v654_v46, %v653_v45 }
 0x21e   : > { %1315 = vmatprep.mubr.bf16.mxu0 %v659_v49  ;;  %1323 = vmatprep.mubr.bf16.mxu1 %v663_v50 }
 0x21f   : > { %1316 = vmatmul.mubr.bf16.gmra.mrb[4].mxu0 %v660_v55  ;;  %1324 = vmatmul.mubr.bf16.gmra.mrb[4].mxu1 %v664_v56 }
 0x2ea   : > { %v1313_v57 = vpop.f32.mrb[0].mxu0  ;;  %v1321_v58 = vpop.f32.mrb[0].mxu1 }
 0x2eb   : > { %v767_v61 = vpop.f32.mrb[1].mxu0  ;;  %v799_v62 = vpop.f32.mrb[1].mxu1 }
 0x2ec   : > { %v1314_v1 = vpop.f32.mrb[2].mxu0  ;;  %v1322_v2 = vpop.f32.mrb[2].mxu1 }
 0x2ed   : > { %v831_v5 = vpack.c.bf16 %v1314_v1, %v1313_v57  ;;  %v835_v6 = vpack.c.bf16 %v1322_v2, %v1321_v58  ;;  %v770_v9 = vpop.f32.mrb[3].mxu0  ;;  %v802_v10 = vpop.f32.mrb[3].mxu1 }
 0x2ee   : > { %v830_v13 = vpack.c.bf16 %v770_v9, %v767_v61  ;;  %v834_v14 = vpack.c.bf16 %v802_v10, %v799_v62 }
 0x2ef   : > { %845 = vst [vmem:[%s843_s21 + $0x8] sm:$0xff] %v831_v5  ;;  %849 = vst [vmem:[%s843_s21 + $0x28] sm:$0xff] %v835_v6 }
 0x2f0   : > { %844 = vst [vmem:[%s843_s21] sm:$0xff] %v830_v13  ;;  %848 = vst [vmem:[%s843_s21 + $0x20] sm:$0xff] %v834_v14 }
 0x2f2   : > { %v1317_v17 = vpop.f32.mrb[4].mxu0  ;;  %v1325_v18 = vpop.f32.mrb[4].mxu1 }
 0x2f3   : > { %v783_v21 = vpop.f32.mrb[5].mxu0  ;;  %v815_v22 = vpop.f32.mrb[5].mxu1 }
 0x2f4   : > { %v1318_v25 = vpop.f32.mrb[6].mxu0  ;;  %v1326_v26 = vpop.f32.mrb[6].mxu1 }
 0x2f5   : > { %v833_v27 = vpack.c.bf16 %v1318_v25, %v1317_v17  ;;  %v837_v28 = vpack.c.bf16 %v1326_v26, %v1325_v18  ;;  %v786_v29 = vpop.f32.mrb[7].mxu0  ;;  %v818_v30 = vpop.f32.mrb[7].mxu1 }
 0x2f6   : > { %v832_v31 = vpack.c.bf16 %v786_v29, %v783_v21  ;;  %v836_v32 = vpack.c.bf16 %v818_v30, %v815_v22 }
 0x2f7   : > { %847 = vst [vmem:[%s843_s21 + $0x18] sm:$0xff] %v833_v27  ;;  %851 = vst [vmem:[%s843_s21 + $0x38] sm:$0xff] %v837_v28 }
 0x2f8   : > { %846 = vst [vmem:[%s843_s21 + $0x10] sm:$0xff] %v832_v31  ;;  %850 = vst [vmem:[%s843_s21 + $0x30] sm:$0xff] %v836_v32 }
 0x2f9 PF: > { %p1175_p8 = scmp.ne.s32.totalorder %s1509_s15, 3 }
 0x2fa   : > { %v856_v33 = vlaneseq (!%p1175_p8) }
 0x2fb   : > { %855 = sbr.rel (%p1175_p8) target bundleno = 1115 (0x45b), region = 48 }
 0x2fc   : > { %v857_v34 = vand.u32 (!%p1175_p8), 127, %v856_v33 }
 0x2fe   : > { %vm858_vm0 = vcmp.lt.s32.totalorder (!%p1175_p8), %v857_v34, 4 }
 0x2ff   : > { %v859_v35 = vsel (!%p1175_p8), %vm858_vm0, %v1662_v63, -1e+30  ;;  %v861_v36 = vsel (!%p1175_p8), %vm858_vm0, %v1658_v59, -1e+30  ;;  %v860_v37 = vsel (!%p1175_p8), %vm858_vm0, %v1670_v7, -1e+30 }
 0x300   : > { %875 = vmax.xlane.f32.xlu0 (!%p1175_p8), %v859_v35  ;;  %879 = vmax.xlane.f32.xlu1 (!%p1175_p8), %v861_v36  ;;  %v862_v38 = vsel (!%p1175_p8), %vm858_vm0, %v1666_v3, -1e+30  ;;  %v863_v39 = vsel (!%p1175_p8), %vm858_vm0, %v1678_v15, -1e+30  ;;  %v864_v40 = vsel (!%p1175_p8), %vm858_vm0, %v1686_v23, -1e+30 }
 0x301   : > { %v865_v59 = vsel (!%p1175_p8), %vm858_vm0, %v1674_v11, -1e+30  ;;  %v866_v63 = vsel (!%p1175_p8), %vm858_vm0, %v1682_v19, -1e+30  ;;  %v867_v3 = vsel (!%p1175_p8), %vm858_vm0, %v1664_v0, -1e+30 }
 0x302   : > { %v868_v7 = vsel %vm858_vm0, %v1672_v8, -1e+30  ;;  %v869_v15 = vsel %vm858_vm0, %v1660_v60, -1e+30  ;;  %v870_v23 = vsel %vm858_vm0, %v1668_v4, -1e+30 }
 0x303   : > { %v1750_v11 = vsel %vm858_vm0, %v1680_v16, -1e+30  ;;  %v1754_v0 = vsel %vm858_vm0, %v1688_v24, -1e+30  ;;  %v1760_v60 = vsel %vm858_vm0, %v1676_v12, -1e+30 }
 0x304   : > { %877 = vmax.xlane.f32.xlu0 %v860_v37  ;;  %881 = vmax.xlane.f32.xlu1 %v862_v38  ;;  %v1764_v4 = vsel %vm858_vm0, %v1684_v20, -1e+30 }
 0x308   : > { %883 = vmax.xlane.f32.xlu0 %v863_v39  ;;  %885 = vmax.xlane.f32.xlu1 %v864_v40 }
 0x30c   : > { %887 = vmax.xlane.f32.xlu0 %v865_v59  ;;  %889 = vmax.xlane.f32.xlu1 %v866_v63 }
 0x310   : > { %891 = vmax.xlane.f32.xlu0 %v867_v3  ;;  %893 = vmax.xlane.f32.xlu1 %v868_v7 }
 0x314   : > { %895 = vmax.xlane.f32.xlu0 %v869_v15  ;;  %897 = vmax.xlane.f32.xlu1 %v870_v23 }
 0x318   : > { %899 = vmax.xlane.f32.xlu0 %v1750_v11  ;;  %901 = vmax.xlane.f32.xlu1 %v1754_v0 }
 0x31c   : > { %903 = vmax.xlane.f32.xlu0 %v1760_v60  ;;  %905 = vmax.xlane.f32.xlu1 %v1764_v4 }
 0x38d   : > { %v876_v8 = vpop.xlane.xlu0 %875  ;;  %v880_v16 = vpop.xlane.xlu1 %879 }
 0x38e   : > { %v1768_v19 = vsub.f32 %v859_v35, %v876_v8  ;;  %v1770_v24 = vsub.f32 %v861_v36, %v880_v16 }
 0x390   : > { %v923_v41 = vmul.f32 1.442695, %v1768_v19  ;;  %v927_v42 = vmul.f32 1.442695, %v1770_v24 }
 0x391   : > { %v878_v12 = vpop.xlane.xlu0 %877  ;;  %v882_v43 = vpop.xlane.xlu1 %881 }
 0x392   : > { %1431 = vpow2.f32 %v923_v41  ;;  %v1774_v44 = vsub.f32 %v860_v37, %v878_v12  ;;  %v1776_v20 = vsub.f32 %v862_v38, %v882_v43 }
 0x393   : > { %1433 = vpow2.f32 %v927_v42 }
 0x394   : > { %v925_v45 = vmul.f32 1.442695, %v1774_v44  ;;  %v929_v46 = vmul.f32 1.442695, %v1776_v20 }
 0x395   : > { %v884_v47 = vpop.xlane.xlu0 %883  ;;  %v886_v48 = vpop.xlane.xlu1 %885 }
 0x396   : > { %1435 = vpow2.f32 %v925_v45  ;;  %v1780_v49 = vsub.f32 %v863_v39, %v884_v47  ;;  %v1782_v50 = vsub.f32 %v864_v40, %v886_v48 }
 0x397   : > { %1437 = vpow2.f32 %v929_v46 }
 0x398   : > { %v931_v51 = vmul.f32 1.442695, %v1780_v49  ;;  %v933_v52 = vmul.f32 1.442695, %v1782_v50 }
 0x399   : > { %v888_v53 = vpop.xlane.xlu0 %887  ;;  %v890_v54 = vpop.xlane.xlu1 %889 }
 0x39a   : > { %1439 = vpow2.f32 %v931_v51  ;;  %v1786_v55 = vsub.f32 %v865_v59, %v888_v53  ;;  %v1788_v56 = vsub.f32 %v866_v63, %v890_v54 }
 0x39b   : > { %1441 = vpow2.f32 %v933_v52 }
 0x39c   : > { %v1432_v57 = vpop.eup %1431  ;;  %v935_v58 = vmul.f32 1.442695, %v1786_v55  ;;  %v937_v61 = vmul.f32 1.442695, %v1788_v56 }
 0x39d   : > { %955 = vadd.xlane.f32.xlu0 %v1432_v57  ;;  %v892_v62 = vpop.xlane.xlu0 %891  ;;  %v894_v1 = vpop.xlane.xlu1 %893 }
 0x39e   : > { %v1434_v2 = vpop.eup %1433  ;;  %1443 = vpow2.f32 %v935_v58  ;;  %v1792_v5 = vsub.f32 %v867_v3, %v892_v62  ;;  %v1794_v6 = vsub.f32 %v868_v7, %v894_v1 }
 0x39f   : > { %1445 = vpow2.f32 %v937_v61 }
 0x3a0   : > { %v1436_v9 = vpop.eup %1435  ;;  %v939_v10 = vmul.f32 1.442695, %v1792_v5  ;;  %v941_v13 = vmul.f32 1.442695, %v1794_v6 }
 0x3a1   : > { %959 = vadd.xlane.f32.xlu0 %v1434_v2  ;;  %957 = vadd.xlane.f32.xlu1 %v1436_v9  ;;  %v896_v14 = vpop.xlane.xlu0 %895  ;;  %v898_v17 = vpop.xlane.xlu1 %897 }
 0x3a2   : > { %v1438_v18 = vpop.eup %1437  ;;  %1447 = vpow2.f32 %v939_v10  ;;  %v1798_v21 = vsub.f32 %v869_v15, %v896_v14  ;;  %v1800_v22 = vsub.f32 %v870_v23, %v898_v17 }
 0x3a3   : > { %1449 = vpow2.f32 %v941_v13 }
 0x3a4   : > { %v1440_v25 = vpop.eup %1439  ;;  %v943_v26 = vmul.f32 1.442695, %v1798_v21  ;;  %v945_v27 = vmul.f32 1.442695, %v1800_v22 }
 0x3a5   : > { %961 = vadd.xlane.f32.xlu1 %v1438_v18  ;;  %963 = vadd.xlane.f32.xlu0 %v1440_v25  ;;  %v900_v28 = vpop.xlane.xlu0 %899  ;;  %v902_v29 = vpop.xlane.xlu1 %901 }
 0x3a6   : > { %v1442_v30 = vpop.eup %1441  ;;  %1451 = vpow2.f32 %v943_v26  ;;  %v1805_v31 = vsub.f32 %v1750_v11, %v900_v28  ;;  %v1808_v32 = vsub.f32 %v1754_v0, %v902_v29 }
 0x3a7   : > { %1453 = vpow2.f32 %v945_v27 }
 0x3a8   : > { %v1444_v33 = vpop.eup %1443  ;;  %v947_v34 = vmul.f32 1.442695, %v1805_v31  ;;  %v949_v35 = vmul.f32 1.442695, %v1808_v32 }
 0x3a9   : > { %965 = vadd.xlane.f32.xlu1 %v1442_v30  ;;  %967 = vadd.xlane.f32.xlu0 %v1444_v33  ;;  %v904_v36 = vpop.xlane.xlu0 %903  ;;  %v906_v37 = vpop.xlane.xlu1 %905 }
 0x3aa   : > { %v1446_v38 = vpop.eup %1445  ;;  %1455 = vpow2.f32 %v947_v34  ;;  %v1813_v39 = vsub.f32 %v1760_v60, %v904_v36  ;;  %v1816_v40 = vsub.f32 %v1764_v4, %v906_v37 }
 0x3ab   : > { %1457 = vpow2.f32 %v949_v35 }
 0x3ac   : > { %v1448_v59 = vpop.eup %1447  ;;  %v951_v63 = vmul.f32 1.442695, %v1813_v39  ;;  %v953_v3 = vmul.f32 1.442695, %v1816_v40 }
 0x3ad   : > { %969 = vadd.xlane.f32.xlu1 %v1446_v38  ;;  %971 = vadd.xlane.f32.xlu0 %v1448_v59  ;;  %v1450_v7 = vpop.eup %1449 }
 0x3ae   : > { %1459 = vpow2.f32 %v951_v63 }
 0x3af   : > { %1461 = vpow2.f32 %v953_v3 }
 0x3b0   : > { %v1452_v15 = vpop.eup %1451 }
 0x3b1   : > { %973 = vadd.xlane.f32.xlu1 %v1450_v7  ;;  %975 = vadd.xlane.f32.xlu0 %v1452_v15  ;;  %v1454_v23 = vpop.eup %1453 }
 0x3b4   : > { %v1456_v11 = vpop.eup %1455 }
 0x3b5   : > { %977 = vadd.xlane.f32.xlu1 %v1454_v23  ;;  %979 = vadd.xlane.f32.xlu0 %v1456_v11  ;;  %v1458_v0 = vpop.eup %1457 }
 0x3b8   : > { %v1460_v60 = vpop.eup %1459 }
 0x3b9   : > { %981 = vadd.xlane.f32.xlu1 %v1458_v0  ;;  %983 = vadd.xlane.f32.xlu0 %v1460_v60  ;;  %v1462_v4 = vpop.eup %1461 }
 0x3bd   : > { %985 = vadd.xlane.f32.xlu1 %v1462_v4 }
 0x42a   : > { %v956_v8 = vpop.xlane.xlu0 %955 }
 0x42b   : > { %1463 = vlog2.f32 %v956_v8 }
 0x42e   : > { %v958_v16 = vpop.xlane.xlu1 %957  ;;  %v960_v41 = vpop.xlane.xlu0 %959 }
 0x42f   : > { %1465 = vlog2.f32 %v958_v16 }
 0x430   : > { %1467 = vlog2.f32 %v960_v41 }
 0x432   : > { %v962_v42 = vpop.xlane.xlu1 %961  ;;  %v964_v12 = vpop.xlane.xlu0 %963 }
 0x433   : > { %1469 = vlog2.f32 %v962_v42 }
 0x434   : > { %1471 = vlog2.f32 %v964_v12 }
 0x435   : > { %v1464_v43 = vpop.eup %1463 }
 0x436   : > { %v988_v45 = vmul.f32 0.6931472, %v1464_v43  ;;  %v966_v46 = vpop.xlane.xlu1 %965  ;;  %v968_v47 = vpop.xlane.xlu0 %967 }
 0x437   : > { %1473 = vlog2.f32 %v966_v46 }
 0x438   : > { %v1019_v48 = vsub.f32 %v1768_v19, %v988_v45  ;;  %1475 = vlog2.f32 %v968_v47 }
 0x439   : > { %v1466_v51 = vpop.eup %1465 }
 0x43a   : > { %v1468_v52 = vpop.eup %1467  ;;  %1035 = vst [vmem:[%s1897_s4] sm:$0xff] %v1019_v48  ;;  %v990_v53 = vmul.f32 0.6931472, %v1466_v51  ;;  %v970_v54 = vpop.xlane.xlu1 %969 }
 0x43b   : > { %v972_v57 = vpop.xlane.xlu0 %971  ;;  %v992_v58 = vmul.f32 0.6931472, %v1468_v52  ;;  %1477 = vlog2.f32 %v970_v54 }
 0x43c   : > { %v1020_v61 = vsub.f32 %v1774_v44, %v990_v53  ;;  %1479 = vlog2.f32 %v972_v57 }
 0x43d   : > { %v1470_v62 = vpop.eup %1469  ;;  %v1021_v1 = vsub.f32 %v1770_v24, %v992_v58 }
 0x43e   : > { %v1472_v2 = vpop.eup %1471  ;;  %1036 = vst [vmem:[%s1897_s4 + $0x8] sm:$0xff] %v1020_v61  ;;  %v994_v19 = vmul.f32 0.6931472, %v1470_v62  ;;  %v974_v9 = vpop.xlane.xlu1 %973 }
 0x43f   : > { %v976_v10 = vpop.xlane.xlu0 %975  ;;  %1037 = vst [vmem:[%s1897_s4 + $0x10] sm:$0xff] %v1021_v1  ;;  %v996_v13 = vmul.f32 0.6931472, %v1472_v2  ;;  %1481 = vlog2.f32 %v974_v9 }
 0x440   : > { %v1022_v44 = vsub.f32 %v1776_v20, %v994_v19  ;;  %1483 = vlog2.f32 %v976_v10 }
 0x441   : > { %v1474_v14 = vpop.eup %1473  ;;  %v1023_v24 = vsub.f32 %v1780_v49, %v996_v13 }
 0x442   : > { %v1476_v17 = vpop.eup %1475  ;;  %1038 = vst [vmem:[%s1897_s4 + $0x18] sm:$0xff] %v1022_v44  ;;  %v998_v18 = vmul.f32 0.6931472, %v1474_v14  ;;  %v978_v25 = vpop.xlane.xlu1 %977 }
 0x443   : > { %v980_v26 = vpop.xlane.xlu0 %979  ;;  %1039 = vst [vmem:[%s1897_s4 + $0x20] sm:$0xff] %v1023_v24  ;;  %v1000_v27 = vmul.f32 0.6931472, %v1476_v17  ;;  %1485 = vlog2.f32 %v978_v25 }
 0x444   : > { %v1024_v20 = vsub.f32 %v1782_v50, %v998_v18  ;;  %1487 = vlog2.f32 %v980_v26 }
 0x445   : > { %v1478_v28 = vpop.eup %1477  ;;  %v1025_v49 = vsub.f32 %v1786_v55, %v1000_v27 }
 0x446   : > { %v1480_v29 = vpop.eup %1479  ;;  %1040 = vst [vmem:[%s1897_s4 + $0x28] sm:$0xff] %v1024_v20  ;;  %v1002_v30 = vmul.f32 0.6931472, %v1478_v28  ;;  %v982_v33 = vpop.xlane.xlu1 %981 }
 0x447   : > { %v984_v34 = vpop.xlane.xlu0 %983  ;;  %1041 = vst [vmem:[%s1897_s4 + $0x30] sm:$0xff] %v1025_v49  ;;  %v1004_v35 = vmul.f32 0.6931472, %v1480_v29  ;;  %1489 = vlog2.f32 %v982_v33 }
 0x448   : > { %v1026_v50 = vsub.f32 %v1788_v56, %v1002_v30  ;;  %1491 = vlog2.f32 %v984_v34 }
 0x449   : > { %v1482_v36 = vpop.eup %1481  ;;  %v1027_v55 = vsub.f32 %v1792_v5, %v1004_v35 }
 0x44a   : > { %v1484_v37 = vpop.eup %1483  ;;  %1042 = vst [vmem:[%s1897_s4 + $0x38] sm:$0xff] %v1026_v50  ;;  %v1006_v38 = vmul.f32 0.6931472, %v1482_v36  ;;  %v986_v59 = vpop.xlane.xlu1 %985 }
 0x44b   : > { %1043 = vst [vmem:[%s1897_s4 + $0x40] sm:$0xff] %v1027_v55  ;;  %v1008_v63 = vmul.f32 0.6931472, %v1484_v37  ;;  %1493 = vlog2.f32 %v986_v59 }
 0x44c   : > { %v1028_v3 = vsub.f32 %v1794_v6, %v1006_v38 }
 0x44d   : > { %v1486_v56 = vpop.eup %1485  ;;  %v1029_v7 = vsub.f32 %v1798_v21, %v1008_v63 }
 0x44e   : > { %v1488_v15 = vpop.eup %1487  ;;  %1044 = vst [vmem:[%s1897_s4 + $0x48] sm:$0xff] %v1028_v3  ;;  %v1010_v5 = vmul.f32 0.6931472, %v1486_v56 }
 0x44f   : > { %1045 = vst [vmem:[%s1897_s4 + $0x50] sm:$0xff] %v1029_v7  ;;  %v1012_v23 = vmul.f32 0.6931472, %v1488_v15 }
 0x450   : > { %v1030_v11 = vsub.f32 %v1800_v22, %v1010_v5 }
 0x451   : > { %v1490_v0 = vpop.eup %1489  ;;  %v1031_v60 = vsub.f32 %v1805_v31, %v1012_v23 }
 0x452   : > { %v1492_v6 = vpop.eup %1491  ;;  %1046 = vst [vmem:[%s1897_s4 + $0x58] sm:$0xff] %v1030_v11  ;;  %v1014_v21 = vmul.f32 0.6931472, %v1490_v0 }
 0x453   : > { %1047 = vst [vmem:[%s1897_s4 + $0x60] sm:$0xff] %v1031_v60  ;;  %v1016_v4 = vmul.f32 0.6931472, %v1492_v6 }
 0x454   : > { %v1032_v8 = vsub.f32 %v1808_v32, %v1014_v21 }
 0x455   : > { %v1494_v16 = vpop.eup %1493  ;;  %v1033_v41 = vsub.f32 %v1813_v39, %v1016_v4 }
 0x456   : > { %1048 = vst [vmem:[%s1897_s4 + $0x68] sm:$0xff] %v1032_v8  ;;  %v1018_v22 = vmul.f32 0.6931472, %v1494_v16 }
 0x457   : > { %1049 = vst [vmem:[%s1897_s4 + $0x70] sm:$0xff] %v1033_v41 }
 0x458   : > { %v1034_v31 = vsub.f32 %v1816_v40, %v1018_v22 }
 0x45a   : > { %1050 = vst [vmem:[%s1897_s4 + $0x78] sm:$0xff] %v1034_v31 }
 0x45b PF: > { %s14_s17 = sadd.s32 1, %s1517_s17   ;;  %s1898_s15 = smov %s1513_s16 }
 0x45c   : > { %p11_p9 = scmp.ge.s32.totalorder %s14_s17, 6   ;;  %s1899_s16 = smov %s1901_s18 }
 0x45e   :  { %13 = sbr.rel (!%p11_p9) target bundleno = 2 (0x2), region = 80 }

</bundles_post_ra>
